<compile_context>
chip_gen: v6e
topology: v6e:2x2x1
jax: 0.10.0
libtpu: 0.0.40
codegen_flags: <defaults>
</compile_context>

<pallas_src>
import functools

import jax
import jax.numpy as jnp
from jax import lax
from jax.experimental import pallas as pl
from jax.experimental.pallas import tpu as pltpu


def _vmem_config():
    """Generation-aware (scoped-VMEM limit, per-tile working-set budget)."""
    cap = None
    try:
        cap = pltpu.get_tpu_info().vmem_capacity_bytes
    except Exception:  # CPU tracing / older runtimes: fall back conservatively
        cap = None
    if cap is not None and cap >= 128 * 1024 * 1024:      # v5e / v6e (128 MiB)
        return 64 * 1024 * 1024, 12 * 1024 * 1024
    return 32 * 1024 * 1024, 6 * 1024 * 1024              # v7x (64 MiB) / unknown


_VMEM_LIMIT, _TILE_BUDGET = _vmem_config()


def _pick_n_tile(n, bytes_per_point, budget=_TILE_BUDGET):
    """Largest N-tile (multiple of 128 dividing n) whose working set fits the
    budget.  Non-128-divisible n (small test shapes) => single full block."""
    if n % 128 != 0:
        return n
    for cand in (2048, 1536, 1024, 768, 512, 384, 256):
        if n % cand == 0 and cand * bytes_per_point <= budget:
            return cand
    return 128


# ----------------------------------------------------------------------------
# Kernel 1: k-NN inverse-distance interpolation, tiled over (batch, N2).
# ----------------------------------------------------------------------------
def _interp_kernel(p2_ref, p1_ref, f1_ref, out_ref, *, k):
    """p2:(1,tile,3) f32  p1:(1,3,N1) f32  f1:(1,C1,N1) bf16  out:(1,C1,tile) bf16."""
    p2 = p2_ref[0]                                   # (tile, 3)  queries
    p1 = p1_ref[0]                                   # (3, N1)    candidates
    f1 = f1_ref[0]                                   # (C1, N1)   bf16

    # Squared pairwise distances on the VPU (avoids the |a|^2+|b|^2-2ab path).
    d2 = None
    for c in range(3):
        diff = p2[:, c:c + 1] - p1[c:c + 1, :]       # (tile, N1)
        sq = diff * diff
        d2 = sq if d2 is None else d2 + sq

    n1 = d2.shape[-1]
    cols = lax.broadcasted_iota(jnp.int32, d2.shape, 1)
    big = jnp.float32(1e30)
    w_mat = jnp.zeros_like(d2)
    d_work = d2
    for _ in range(k):  # k is small and static: unrolled top-k-smallest
        minval = jnp.min(d_work, axis=-1, keepdims=True)            # (tile,1)
        # first occurrence among exact ties (matches a single topk pick)
        sel = jnp.min(jnp.where(d_work == minval, cols, n1),
                      axis=-1, keepdims=True)
        hit = cols == sel
        w = 1.0 / (jnp.sqrt(minval) + 1e-10)   # sqrt only on selected minima
        w_mat = w_mat + jnp.where(hit, w, 0.0)
        d_work = jnp.where(hit, big, d_work)
    # TODO(synk): for very large N1, chunk the N1 axis with a running k-smallest
    # merge to keep the (tile, N1) working set resident in vregs.

    w_mat = w_mat / jnp.sum(w_mat, axis=-1, keepdims=True)
    # (C1, tile) = f1 (C1,N1) @ w_mat^T (N1,tile); bf16 MXU operands, f32 acc.
    out_ref[0] = lax.dot_general(
        f1, w_mat.astype(jnp.bfloat16), (((1,), (1,)), ((), ())),
        preferred_element_type=jnp.float32).astype(jnp.bfloat16)


# ----------------------------------------------------------------------------
# Kernel 2: first layer — VMEM concat of input groups, single 1x1 conv matmul,
#           per-B / per-channel sum & sum-of-squares accumulation.
# Bias is intentionally dropped (cancels under train-mode BatchNorm).
# ----------------------------------------------------------------------------
def _make_layer0_kernel(n_groups):
    def kernel(*refs):
        xs = refs[:n_groups]                          # each (1, Cg, tile)
        w_ref = refs[n_groups]                        # (Cout, sumC) bf16
        y_ref, sum_ref, sq_ref = refs[n_groups + 1:]  # y bf16, stats f32

        # Fold the channel concat into VMEM, then one MXU matmul (K = sumC).
        x = jnp.concatenate(
            [xs[g][0].astype(jnp.float32) for g in range(n_groups)], axis=0)
        y = lax.dot_general(w_ref[...], x.astype(jnp.bfloat16),
                            (((1,), (0,)), ((), ())),
                            preferred_element_type=jnp.float32)   # (Cout, tile)
        y_ref[0] = y.astype(jnp.bfloat16)

        @pl.when(pl.program_id(1) == 0)               # per-B partial stats init
        def _():
            sum_ref[...] = jnp.zeros_like(sum_ref)
            sq_ref[...] = jnp.zeros_like(sq_ref)

        sum_ref[0] += jnp.sum(y, axis=1, keepdims=True)             # (Cout, 1)
        sq_ref[0] += jnp.sum(y * y, axis=1, keepdims=True)          # (Cout, 1)
    return kernel


# ----------------------------------------------------------------------------
# Kernel 3: fused [BatchNorm(prev stats) + ReLU] -> 1x1 conv -> this layer's
#           per-B stats.  Used for every layer after the first.
# ----------------------------------------------------------------------------
def _fused_bn_linear_kernel(y_prev_ref, ss_ref, w_ref, y_ref, sum_ref, sq_ref):
    x = y_prev_ref[0].astype(jnp.float32)             # (Cin, tile)
    ss = ss_ref[...]                                  # (Cin, 2) = [scale|shift]
    x = jnp.maximum(x * ss[:, 0:1] + ss[:, 1:2], 0.0)  # BN + ReLU in registers
    y = lax.dot_general(w_ref[...], x.astype(jnp.bfloat16),
                        (((1,), (0,)), ((), ())),
                        preferred_element_type=jnp.float32)        # (Cout, tile)
    y_ref[0] = y.astype(jnp.bfloat16)

    @pl.when(pl.program_id(1) == 0)
    def _():
        sum_ref[...] = jnp.zeros_like(sum_ref)
        sq_ref[...] = jnp.zeros_like(sq_ref)

    sum_ref[0] += jnp.sum(y, axis=1, keepdims=True)
    sq_ref[0] += jnp.sum(y * y, axis=1, keepdims=True)


# ----------------------------------------------------------------------------
# Kernel 4: standalone BN + ReLU for the final layer only.
# ----------------------------------------------------------------------------
def _final_bn_relu_kernel(y_ref, ss_ref, out_ref):
    y = y_ref[0].astype(jnp.float32)                  # (Cout, tile)
    ss = ss_ref[...]                                  # (Cout, 2)
    out_ref[0] = jnp.maximum(y * ss[:, 0:1] + ss[:, 1:2], 0.0)


def _scale_shift(sum_b, sq_b, gamma, beta, m, eps):
    """Reduce per-B partial stats and fold mean/var/gamma/beta into (scale, shift)."""
    s = jnp.sum(sum_b, axis=0)[:, 0]                  # (Cout,)
    q = jnp.sum(sq_b, axis=0)[:, 0]
    mean = s / m
    var = jnp.maximum(q / m - mean * mean, 0.0)       # biased batch variance
    scale = gamma.astype(jnp.float32) * lax.rsqrt(var + eps)
    shift = beta.astype(jnp.float32) - mean * scale
    return jnp.stack([scale, shift], axis=1)          # (Cout, 2) f32


# ----------------------------------------------------------------------------
# Wrapper
# ----------------------------------------------------------------------------
def set_up_conv_forward(points1, points2, features1, features2, skip_features,
                        params, *, k):
    """points*: (B,3,N*), features1: (B,C1,N1), features2: (B,C2,N2),
    skip_features: (B,Cs,N2) or None.  Returns (B, out_channels[-1], N2) f32."""
    B, _, N1 = points1.shape
    N2 = points2.shape[2]
    C1 = features1.shape[1]
    f32, bf16 = jnp.float32, jnp.bfloat16

    p1 = points1.astype(f32)                               # (B, 3, N1)
    p2t = jnp.transpose(points2, (0, 2, 1)).astype(f32)    # (B, N2, 3), tiny
    f1 = features1.astype(bf16)                            # (B, C1, N1) bf16

    # --- k-NN interpolation: grid (B, N2 tiles), fully parallel ------------
    tile_i = _pick_n_tile(N2, 6 * 4 * N1)
    interp = pl.pallas_call(
        functools.partial(_interp_kernel, k=k),
        out_shape=jax.ShapeDtypeStruct((B, C1, N2), bf16),
        grid=(B, N2 // tile_i),
        in_specs=[
            pl.BlockSpec((1, tile_i, 3), lambda b, t: (b, t, 0)),
            pl.BlockSpec((1, 3, N1), lambda b, t: (b, 0, 0)),
            pl.BlockSpec((1, C1, N1), lambda b, t: (b, 0, 0)),
        ],
        out_specs=pl.BlockSpec((1, C1, tile_i), lambda b, t: (b, 0, t)),
        compiler_params=pltpu.CompilerParams(
            dimension_semantics=("parallel", "parallel"),
            vmem_limit_bytes=_VMEM_LIMIT),
    )(p2t, p1, f1)                                         # (B, C1, N2) bf16

    # --- MLP: layer0 (concat+conv+stats), then fused BN+ReLU+conv+stats -----
    groups = [interp, features2.astype(f32)]
    if skip_features is not None:
        groups.append(skip_features.astype(f32))
    cins = [g.shape[1] for g in groups]
    cin_total = sum(cins)

    M = float(B * N2)   # batch*spatial element count for BatchNorm2d stats
    eps = 1e-3          # module uses BatchNorm2d(eps=0.001)

    y = None
    ss = None
    for li, (w, _b, gamma, beta) in enumerate(params):
        # _b (conv bias) is unused: it cancels exactly under train-mode BN.
        cout = w.shape[0]
        w_bf = w.astype(bf16)

        if li == 0:
            tile = _pick_n_tile(N2, 12 * (cin_total + cout))
            nt = N2 // tile
            in_specs = ([pl.BlockSpec((1, c, tile), lambda bb, t: (bb, 0, t))
                         for c in cins]
                        + [pl.BlockSpec((cout, cin_total), lambda bb, t: (0, 0))])
            y, s_sum, s_sq = pl.pallas_call(
                _make_layer0_kernel(len(groups)),
                out_shape=(jax.ShapeDtypeStruct((B, cout, N2), bf16),
                           jax.ShapeDtypeStruct((B, cout, 1), f32),
                           jax.ShapeDtypeStruct((B, cout, 1), f32)),
                grid=(B, nt),
                in_specs=in_specs,
                out_specs=(pl.BlockSpec((1, cout, tile), lambda bb, t: (bb, 0, t)),
                           pl.BlockSpec((1, cout, 1), lambda bb, t: (bb, 0, 0)),
                           pl.BlockSpec((1, cout, 1), lambda bb, t: (bb, 0, 0))),
                compiler_params=pltpu.CompilerParams(
                    # B parallel (megacore-safe: per-B stat blocks); tile axis
                    # arbitrary because the stat blocks are resident across it.
                    dimension_semantics=("parallel", "arbitrary"),
                    vmem_limit_bytes=_VMEM_LIMIT),
            )(*groups, w_bf)
        else:
            cin = w.shape[1]
            tile = _pick_n_tile(N2, 12 * (cin + cout))
            nt = N2 // tile
            y, s_sum, s_sq = pl.pallas_call(
                _fused_bn_linear_kernel,
                out_shape=(jax.ShapeDtypeStruct((B, cout, N2), bf16),
                           jax.ShapeDtypeStruct((B, cout, 1), f32),
                           jax.ShapeDtypeStruct((B, cout, 1), f32)),
                grid=(B, nt),
                in_specs=[
                    pl.BlockSpec((1, cin, tile), lambda bb, t: (bb, 0, t)),
                    pl.BlockSpec((cin, 2), lambda bb, t: (0, 0)),
                    pl.BlockSpec((cout, cin), lambda bb, t: (0, 0)),
                ],
                out_specs=(pl.BlockSpec((1, cout, tile), lambda bb, t: (bb, 0, t)),
                           pl.BlockSpec((1, cout, 1), lambda bb, t: (bb, 0, 0)),
                           pl.BlockSpec((1, cout, 1), lambda bb, t: (bb, 0, 0))),
                compiler_params=pltpu.CompilerParams(
                    dimension_semantics=("parallel", "arbitrary"),
                    vmem_limit_bytes=_VMEM_LIMIT),
            )(y, ss, w_bf)

        # tiny per-channel reductions / affine folding between pallas_calls
        ss = _scale_shift(s_sum, s_sq, gamma, beta, M, eps)

    # --- standalone BN + ReLU only for the last layer -----------------------
    cout = params[-1][0].shape[0]
    tile = _pick_n_tile(N2, 12 * cout)
    nt = N2 // tile
    out = pl.pallas_call(
        _final_bn_relu_kernel,
        out_shape=jax.ShapeDtypeStruct((B, cout, N2), f32),
        grid=(B, nt),
        in_specs=[
            pl.BlockSpec((1, cout, tile), lambda bb, t: (bb, 0, t)),
            pl.BlockSpec((cout, 2), lambda bb, t: (0, 0)),
        ],
        out_specs=pl.BlockSpec((1, cout, tile), lambda bb, t: (bb, 0, t)),
        compiler_params=pltpu.CompilerParams(
            dimension_semantics=("parallel", "parallel"),
            vmem_limit_bytes=_VMEM_LIMIT),
    )(y, ss)

    return out                                             # (B, Cout_last, N2)


# ----------------------------------------------------------------------------
# Deterministic parameter init (Conv2d 1x1 weight (Cout,Cin), bias (Cout,);
# BatchNorm default init gamma=1, beta=0).  Bias is kept for interface parity
# but is mathematically a no-op under train-mode BatchNorm.
# ----------------------------------------------------------------------------
def init_params(key, in_channels, out_channels):
    params = []
    cin = in_channels
    for cout in out_channels:
        key, kw, kb = jax.random.split(key, 3)
        w = jax.random.normal(kw, (cout, cin), jnp.float32) * 0.1
        b = jax.random.normal(kb, (cout,), jnp.float32) * 0.01
        gamma = jnp.ones((cout,), jnp.float32)
        beta = jnp.zeros((cout,), jnp.float32)
        params.append((w, b, gamma, beta))
        cin = cout
    return params


if __name__ == "__main__":
    key = jax.random.PRNGKey(0)
    B, N1, N2 = 2, 32, 16
    C1, C2 = 8, 16
    skip_channels = (4,)
    out_channels = (32, 16)
    k = 3

    ks = jax.random.split(key, 6)
    points1 = jax.random.normal(ks[0], (B, 3, N1), jnp.float32)
    points2 = jax.random.normal(ks[1], (B, 3, N2), jnp.float32)
    features1 = jax.random.normal(ks[2], (B, C1, N1), jnp.float32)
    features2 = jax.random.normal(ks[3], (B, C2, N2), jnp.float32)
    skip_features = jax.random.normal(ks[4], (B, skip_channels[0], N2),
                                      jnp.float32)

    in_channels = C1 + C2 + sum(skip_channels)
    params = init_params(ks[5], in_channels, out_channels)

    out = set_up_conv_forward(points1, points2, features1, features2,
                              skip_features, params, k=k)
    out = jax.block_until_ready(out)
    assert out.shape == (B, out_channels[-1], N2), out.shape
    assert out.dtype == jnp.float32
    assert bool(jnp.all(jnp.isfinite(out)))
    print("KERNEL_OK")
</pallas_src>

<mosaic_0001>
module attributes {stable_mosaic.version = 11 : i64} {
  func.func @_interp_kernel(%arg0: i32, %arg1: i32, %arg2: memref<1x16x3xf32, #tpu.memory_space<vmem>>, %arg3: memref<1x3x32xf32, #tpu.memory_space<vmem>>, %arg4: memref<1x8x32xbf16, #tpu.memory_space<vmem>>, %arg5: memref<1x8x16xbf16, #tpu.memory_space<vmem>>) attributes {dimension_semantics = [#tpu.dimension_semantics<parallel>, #tpu.dimension_semantics<parallel>], iteration_bounds = array<i64: 2, 1>, scalar_prefetch = 0 : i64, scratch_operands = 0 : i64, tpu.core_type = #tpu.core_type<tc>, window_params = [{transform_indices = @transform_0, window_bounds = array<i64: 1, 16, 3>}, {transform_indices = @transform_1, window_bounds = array<i64: 1, 3, 32>}, {transform_indices = @transform_2, window_bounds = array<i64: 1, 8, 32>}, {transform_indices = @transform_3, window_bounds = array<i64: 1, 8, 16>}]} {
    %c0 = arith.constant 0 : index
    %c0_0 = arith.constant 0 : index
    %c0_1 = arith.constant 0 : index
    %0 = vector.load %arg2[%c0, %c0_0, %c0_1] : memref<1x16x3xf32, #tpu.memory_space<vmem>>, vector<1x16x3xf32>
    %1 = vector.shape_cast %0 : vector<1x16x3xf32> to vector<16x3xf32>
    %c0_2 = arith.constant 0 : index
    %c0_3 = arith.constant 0 : index
    %c0_4 = arith.constant 0 : index
    %2 = vector.load %arg3[%c0_2, %c0_3, %c0_4] : memref<1x3x32xf32, #tpu.memory_space<vmem>>, vector<1x3x32xf32>
    %3 = vector.shape_cast %2 : vector<1x3x32xf32> to vector<3x32xf32>
    %c0_5 = arith.constant 0 : index
    %c0_6 = arith.constant 0 : index
    %c0_7 = arith.constant 0 : index
    %4 = vector.load %arg4[%c0_5, %c0_6, %c0_7] : memref<1x8x32xbf16, #tpu.memory_space<vmem>>, vector<1x8x32xbf16>
    %5 = vector.shape_cast %4 : vector<1x8x32xbf16> to vector<8x32xbf16>
    %6 = vector.extract_strided_slice %1 {offsets = [0, 0], sizes = [16, 1], strides = [1, 1]} : vector<16x3xf32> to vector<16x1xf32>
    %7 = vector.extract_strided_slice %3 {offsets = [0, 0], sizes = [1, 32], strides = [1, 1]} : vector<3x32xf32> to vector<1x32xf32>
    %8 = vector.broadcast %6 : vector<16x1xf32> to vector<16x32xf32>
    %9 = vector.broadcast %7 : vector<1x32xf32> to vector<16x32xf32>
    %10 = arith.subf %8, %9 : vector<16x32xf32>
    %11 = arith.mulf %10, %10 : vector<16x32xf32>
    %12 = vector.extract_strided_slice %1 {offsets = [0, 1], sizes = [16, 1], strides = [1, 1]} : vector<16x3xf32> to vector<16x1xf32>
    %13 = vector.extract_strided_slice %3 {offsets = [1, 0], sizes = [1, 32], strides = [1, 1]} : vector<3x32xf32> to vector<1x32xf32>
    %14 = vector.broadcast %12 : vector<16x1xf32> to vector<16x32xf32>
    %15 = vector.broadcast %13 : vector<1x32xf32> to vector<16x32xf32>
    %16 = arith.subf %14, %15 : vector<16x32xf32>
    %17 = arith.mulf %16, %16 : vector<16x32xf32>
    %18 = arith.addf %11, %17 : vector<16x32xf32>
    %19 = vector.extract_strided_slice %1 {offsets = [0, 2], sizes = [16, 1], strides = [1, 1]} : vector<16x3xf32> to vector<16x1xf32>
    %20 = vector.extract_strided_slice %3 {offsets = [2, 0], sizes = [1, 32], strides = [1, 1]} : vector<3x32xf32> to vector<1x32xf32>
    %21 = vector.broadcast %19 : vector<16x1xf32> to vector<16x32xf32>
    %22 = vector.broadcast %20 : vector<1x32xf32> to vector<16x32xf32>
    %23 = arith.subf %21, %22 : vector<16x32xf32>
    %24 = arith.mulf %23, %23 : vector<16x32xf32>
    %25 = arith.addf %18, %24 : vector<16x32xf32>
    %26 = tpu.iota {dimensions = array<i32: 1>} : vector<16x32xi32>
    %cst = arith.constant 0.000000e+00 : f32
    %27 = vector.broadcast %cst : f32 to vector<16x32xf32>
    %cst_8 = arith.constant dense<0x7F800000> : vector<16xf32>
    %28 = vector.multi_reduction <minimumf>, %25, %cst_8 [1] : vector<16x32xf32> to vector<16xf32>
    %29 = vector.shape_cast %28 : vector<16xf32> to vector<16x1xf32>
    %30 = vector.broadcast %29 : vector<16x1xf32> to vector<16x32xf32>
    %31 = arith.cmpf oeq, %25, %30 : vector<16x32xf32>
    %c32_i32 = arith.constant 32 : i32
    %32 = vector.broadcast %c32_i32 : i32 to vector<16x32xi32>
    %33 = arith.select %31, %26, %32 : vector<16x32xi1>, vector<16x32xi32>
    %cst_9 = arith.constant dense<2147483647> : vector<16xi32>
    %34 = vector.multi_reduction <minsi>, %33, %cst_9 [1] : vector<16x32xi32> to vector<16xi32>
    %35 = vector.shape_cast %34 : vector<16xi32> to vector<16x1xi32>
    %36 = vector.broadcast %35 : vector<16x1xi32> to vector<16x32xi32>
    %37 = arith.cmpi eq, %26, %36 : vector<16x32xi32>
    %38 = math.sqrt %29 : vector<16x1xf32>
    %cst_10 = arith.constant 1.000000e-10 : f32
    %39 = vector.broadcast %cst_10 : f32 to vector<16x1xf32>
    %40 = arith.addf %38, %39 : vector<16x1xf32>
    %cst_11 = arith.constant 1.000000e+00 : f32
    %41 = vector.broadcast %cst_11 : f32 to vector<16x1xf32>
    %42 = arith.divf %41, %40 : vector<16x1xf32>
    %cst_12 = arith.constant 0.000000e+00 : f32
    %43 = vector.shape_cast %42 : vector<16x1xf32> to vector<16x1xf32>
    %44 = vector.broadcast %43 : vector<16x1xf32> to vector<16x32xf32>
    %45 = vector.broadcast %cst_12 : f32 to vector<16x32xf32>
    %46 = arith.select %37, %44, %45 : vector<16x32xi1>, vector<16x32xf32>
    %47 = arith.addf %27, %46 : vector<16x32xf32>
    %cst_13 = arith.constant 1.000000e+30 : f32
    %48 = vector.broadcast %cst_13 : f32 to vector<16x32xf32>
    %49 = arith.select %37, %48, %25 : vector<16x32xi1>, vector<16x32xf32>
    %cst_14 = arith.constant dense<0x7F800000> : vector<16xf32>
    %50 = vector.multi_reduction <minimumf>, %49, %cst_14 [1] : vector<16x32xf32> to vector<16xf32>
    %51 = vector.shape_cast %50 : vector<16xf32> to vector<16x1xf32>
    %52 = vector.broadcast %51 : vector<16x1xf32> to vector<16x32xf32>
    %53 = arith.cmpf oeq, %49, %52 : vector<16x32xf32>
    %c32_i32_15 = arith.constant 32 : i32
    %54 = vector.broadcast %c32_i32_15 : i32 to vector<16x32xi32>
    %55 = arith.select %53, %26, %54 : vector<16x32xi1>, vector<16x32xi32>
    %cst_16 = arith.constant dense<2147483647> : vector<16xi32>
    %56 = vector.multi_reduction <minsi>, %55, %cst_16 [1] : vector<16x32xi32> to vector<16xi32>
    %57 = vector.shape_cast %56 : vector<16xi32> to vector<16x1xi32>
    %58 = vector.broadcast %57 : vector<16x1xi32> to vector<16x32xi32>
    %59 = arith.cmpi eq, %26, %58 : vector<16x32xi32>
    %60 = math.sqrt %51 : vector<16x1xf32>
    %cst_17 = arith.constant 1.000000e-10 : f32
    %61 = vector.broadcast %cst_17 : f32 to vector<16x1xf32>
    %62 = arith.addf %60, %61 : vector<16x1xf32>
    %cst_18 = arith.constant 1.000000e+00 : f32
    %63 = vector.broadcast %cst_18 : f32 to vector<16x1xf32>
    %64 = arith.divf %63, %62 : vector<16x1xf32>
    %cst_19 = arith.constant 0.000000e+00 : f32
    %65 = vector.shape_cast %64 : vector<16x1xf32> to vector<16x1xf32>
    %66 = vector.broadcast %65 : vector<16x1xf32> to vector<16x32xf32>
    %67 = vector.broadcast %cst_19 : f32 to vector<16x32xf32>
    %68 = arith.select %59, %66, %67 : vector<16x32xi1>, vector<16x32xf32>
    %69 = arith.addf %47, %68 : vector<16x32xf32>
    %cst_20 = arith.constant 1.000000e+30 : f32
    %70 = vector.broadcast %cst_20 : f32 to vector<16x32xf32>
    %71 = arith.select %59, %70, %49 : vector<16x32xi1>, vector<16x32xf32>
    %cst_21 = arith.constant dense<0x7F800000> : vector<16xf32>
    %72 = vector.multi_reduction <minimumf>, %71, %cst_21 [1] : vector<16x32xf32> to vector<16xf32>
    %73 = vector.shape_cast %72 : vector<16xf32> to vector<16x1xf32>
    %74 = vector.broadcast %73 : vector<16x1xf32> to vector<16x32xf32>
    %75 = arith.cmpf oeq, %71, %74 : vector<16x32xf32>
    %c32_i32_22 = arith.constant 32 : i32
    %76 = vector.broadcast %c32_i32_22 : i32 to vector<16x32xi32>
    %77 = arith.select %75, %26, %76 : vector<16x32xi1>, vector<16x32xi32>
    %cst_23 = arith.constant dense<2147483647> : vector<16xi32>
    %78 = vector.multi_reduction <minsi>, %77, %cst_23 [1] : vector<16x32xi32> to vector<16xi32>
    %79 = vector.shape_cast %78 : vector<16xi32> to vector<16x1xi32>
    %80 = vector.broadcast %79 : vector<16x1xi32> to vector<16x32xi32>
    %81 = arith.cmpi eq, %26, %80 : vector<16x32xi32>
    %82 = math.sqrt %73 : vector<16x1xf32>
    %cst_24 = arith.constant 1.000000e-10 : f32
    %83 = vector.broadcast %cst_24 : f32 to vector<16x1xf32>
    %84 = arith.addf %82, %83 : vector<16x1xf32>
    %cst_25 = arith.constant 1.000000e+00 : f32
    %85 = vector.broadcast %cst_25 : f32 to vector<16x1xf32>
    %86 = arith.divf %85, %84 : vector<16x1xf32>
    %cst_26 = arith.constant 0.000000e+00 : f32
    %87 = vector.shape_cast %86 : vector<16x1xf32> to vector<16x1xf32>
    %88 = vector.broadcast %87 : vector<16x1xf32> to vector<16x32xf32>
    %89 = vector.broadcast %cst_26 : f32 to vector<16x32xf32>
    %90 = arith.select %81, %88, %89 : vector<16x32xi1>, vector<16x32xf32>
    %91 = arith.addf %69, %90 : vector<16x32xf32>
    %cst_27 = arith.constant dense<0.000000e+00> : vector<16xf32>
    %92 = vector.multi_reduction <add>, %91, %cst_27 [1] : vector<16x32xf32> to vector<16xf32>
    %93 = vector.shape_cast %92 : vector<16xf32> to vector<16x1xf32>
    %94 = vector.broadcast %93 : vector<16x1xf32> to vector<16x32xf32>
    %95 = arith.divf %91, %94 : vector<16x32xf32>
    %96 = arith.truncf %95 : vector<16x32xf32> to vector<16x32xbf16>
    %cst_28 = arith.constant dense<0.000000e+00> : vector<8x16xf32>
    %97 = tpu.matmul %5, %96, %cst_28 {dimension_numbers = #tpu.dot_dimension_numbers<[1], [1], [0], [0], [0, 0, 1, 0], [], []>} : vector<8x32xbf16>, vector<16x32xbf16>, vector<8x16xf32> -> vector<8x16xf32>
    %98 = arith.truncf %97 : vector<8x16xf32> to vector<8x16xbf16>
    %c0_29 = arith.constant 0 : index
    %c0_30 = arith.constant 0 : index
    %c0_31 = arith.constant 0 : index
    %99 = vector.load %arg5[%c0_29, %c0_30, %c0_31] : memref<1x8x16xbf16, #tpu.memory_space<vmem>>, vector<1x8x16xbf16>
    %100 = vector.shape_cast %99 : vector<1x8x16xbf16> to vector<8x16xbf16>
    %101 = vector.shape_cast %98 : vector<8x16xbf16> to vector<1x8x16xbf16>
    tpu.vector_store %arg5[%c0_29, %c0_30, %c0_31], %101 {strides = array<i32>} : memref<1x8x16xbf16, #tpu.memory_space<vmem>>, vector<1x8x16xbf16>,
    return
  }
  func.func @transform_0(%arg0: i32, %arg1: i32) -> (i32, i32, i32) {
    %c0_i32 = arith.constant 0 : i32
    %c0_i32_0 = arith.constant 0 : i32
    return %arg0, %arg1, %c0_i32 : i32, i32, i32
  }
  func.func @transform_1(%arg0: i32, %arg1: i32) -> (i32, i32, i32) {
    %c0_i32 = arith.constant 0 : i32
    %c0_i32_0 = arith.constant 0 : i32
    %c0_i32_1 = arith.constant 0 : i32
    return %arg0, %c0_i32, %c0_i32_0 : i32, i32, i32
  }
  func.func @transform_2(%arg0: i32, %arg1: i32) -> (i32, i32, i32) {
    %c0_i32 = arith.constant 0 : i32
    %c0_i32_0 = arith.constant 0 : i32
    %c0_i32_1 = arith.constant 0 : i32
    return %arg0, %c0_i32, %c0_i32_0 : i32, i32, i32
  }
  func.func @transform_3(%arg0: i32, %arg1: i32) -> (i32, i32, i32) {
    %c0_i32 = arith.constant 0 : i32
    %c0_i32_0 = arith.constant 0 : i32
    return %arg0, %c0_i32, %arg1 : i32, i32, i32
  }
}

</mosaic_0001>

<bundles_post_ra>
// kernel: tpu_custom_call.1
= control target key start
LH: loop header
LB: loop body
LE: loop exit
PB: predicated region body
PF: predicated region fallthrough
CT: control target
= control target key end

     0   :  { %8 = vsyncpa [#allocation3], 0  ;;  %s1097_s0 = inlined_call_operand.vmem [shape: f32[2,16,3], index: 0, kind: input, shape index: {}]   ;;  %s1098_s1 = inlined_call_operand.vmem [shape: f32[2,3,32], index: 1, kind: input, shape index: {}]   ;;  %s1099_s2 = inlined_call_operand.vmem [shape: bf16[2,8,32], index: 2, kind: input, shape index: {}]   ;;  %s1100_s3 = inlined_call_operand.hbm [shape: bf16[2,8,16], index: 3, kind: output, shape index: {}]  }
   0x1   :  { %10 = vsyncpa [#allocation3 + $0x1], 0  ;;  %s890_s12 = smov 0   ;;  %s892_s13 = smov 0  }
   0x2   :  { %s894_s14 = smov 0   ;;  %s896_s15 = smov 0  }
   0x3   :  { %s898_s16 = smov 0   ;;  %s900_s17 = smov 0  }
   0x4 LB: > { %s670_s18 = sadd.s32 4294967295, %s862_s17   ;;  %s671_s19 = sadd.s32 4294967294, %s862_s17   ;;  %s862_s17 = sphi %s900_s17, %s16_s17   ;;  %s858_s16 = sphi %s898_s16, %s1107_s16   ;;  %s854_s15 = sphi %s896_s15, %s1106_s15   ;;  %s850_s14 = sphi %s894_s14, %s1105_s14   ;;  %s846_s13 = sphi %s892_s13, %s1104_s13   ;;  %s842_s12 = sphi %s890_s12, %s1103_s12  }
   0x5   : > { %s28_s20 = sadd.s32 1, %s858_s16  ;;  %s117_s21 = sadd.s32 1, %s850_s14 }
   0x6   : > { %p30_p0 = scmp.ge.s32.totalorder %s28_s20, 2  ;;  %p127_p1 = scmp.ne.s32.totalorder %s850_s14, %s846_s13 }
   0x7   : > { %p128_p2 = scmp.eq.s32.totalorder %s670_s18, 1  ;;  %p133_p3 = scmp.ne.s32.totalorder %s846_s13, %s842_s12 }
   0x8   : > { %s1109_s20 = smov (%p30_p0, %s28_s20), 0  ;;  %p134_p5 = scmp.eq.s32.totalorder %s671_s19, 1 }
   0x9   : > { %p930_p4 = por %p128_p2, %p127_p1  ;;  %s112_s23 = ssub.s32 %s858_s16, %s1109_s20 }
   0xa   : > { %p674_p6 = scmp.ge.s32.totalorder %s862_s17, 1  ;;  %p115_p7 = scmp.eq.s32.totalorder %s112_s23, 0 }
   0xb   : > { %p937_p8 = por %p134_p5, %p133_p3  ;;  %p179_p9 = scmp.lt.s32.totalorder %s862_s17, 3 }
   0xc   : > { %s943_s25 = scalar_select %p115_p7, %s850_s14, %s117_s21  }
   0xd   : > { %p180_p10 = pnand %p674_p6, %p179_p9 }
   0xe   : > { %p216_p11 = scmp.lt.s32.totalorder (!%p180_p10), %s854_s15, 1  ;;  %s212_s11 = sand.u32 (!%p180_p10), 1, %s846_s13  }
   0xf   : > { %183 = sbr.rel (%p180_p10) target bundleno = 1831 (0x727), region = 32  ;;  %s675_s18 = sshll.u32 (!%p180_p10), %s212_s11, 2 }
  0x10   : > { %s682_s19 = sshll.u32 (!%p180_p10), %s854_s15, 6  ;;  %s214_s21 = scalar_lea.vmem (!%p180_p10), [#allocation2], %s675_s18 }
  0x11   : > { %s572_s23 = sshll.u32 (!%p180_p10), %s214_s21, 4  ;;  %s558_s29 = scalar_lea.sflag (!%p180_p10), [#allocation3], %s212_s11  ;;  %s1053_s23 = int_to_ptr.vmem [resolvable:$true] %s572_s23 }
  0x14   : > { %v864_v0 = vmov 1   ;;  %v865_v1 = vmov 0   ;;  %s947_s26 = scalar_select %p216_p11, %s854_s15, 1  ;;  %v866_v4 = vmov 2   ;;  %v248_v5 = vlaneseq }
  0x15   : > { %755 = vset.pattern.permute.xlu1 %v864_v0  ;;  %754 = vset.pattern.permute.xlu0 %v865_v1  ;;  %vm294_vm0 = vcmask 261120   ;;  %s786_s15 = scalar_lea.vmem %s1053_s23, 64 }
  0x16   : > { %s685_s27 = sshll.u32 %s947_s26, 4  ;;  %s678_s4 = sshll.u32 %s947_s26, 2  ;;  %v249_v6 = vshrl.u32 %v248_v5, 7  ;;  %v961_v38 = vand.u32 127, %v248_v5 }
  0x17   : > { %s223_s30 = scalar_lea.vmem %s1097_s0, %s685_s27  ;;  %s228_s7 = scalar_lea.vmem %s1098_s1, %s678_s4 }
  0x18   : > { %v234_v2 = vld [vmem:[%s223_s30] sm:$0xff]  ;;  %v235_v3 = vld [vmem:[%s223_s30 + $0x8] sm:$0xff]  ;;  %v266_v7 = vsub.s32 1, %v249_v6  ;;  %v250_v8 = vsub.s32 0, %v249_v6  ;;  %v284_v14 = vsub.s32 2, %v249_v6  ;;  %s232_s10 = scalar_lea.vmem %s1099_s2, %s678_s4  ;;  %s1051_s26 = scalar_lea.hbm %s1100_s3, %s682_s19 }
  0x19   : > { %257 = vperm.xlu1 %755, %v234_v2   ;;  %240 = vperm.xlu0 %754, %v234_v2   ;;  %v236_v9 = vld [vmem:[%s228_s7] sm:$0x7]  ;;  %p787_p12 = scmp.ne.s32.totalorder %s1053_s23, %s786_s15  ;;  %s869_s30 = smov [#allocation2]  }
  0x1a   : > { %v267_v10 = vrot.slane %v236_v9, %v266_v7  ;;  %v251_v12 = vrot.slane %v236_v9, %v250_v8  ;;  %v285_v21 = vrot.slane %v236_v9, %v284_v14  ;;  %s790_s4 = sshll.u32 %s869_s30, 4  ;;  %s791_s4 = int_to_ptr.vmem [resolvable:$false] %s790_s4 }
  0x1b   : > { %p788_p13 = pnand %p787_p12, %p930_p4  ;;  %s792_s5 = scalar_lea.vmem %s791_s4, 128 }
  0x1c   : > { %p793_p1 = scmp.lt.s32.totalorder %s1053_s23, %s791_s4  ;;  %p794_p2 = scmp.lt.s32.totalorder %s792_s5, %s786_s15 }
  0x1d   : > { %261 = vperm.xlu1 %755, %v235_v3   ;;  %245 = vperm.xlu0 %754, %v235_v3   ;;  %p789_p0 = pneg %p788_p13 }
  0x1e   : > { %p795_p3 = por %p794_p2, %p793_p1 }
  0x20   : > { %p796_p5 = pnand %p795_p3, %p789_p0 }
  0x21   : > { %757 = vset.pattern.permute.xlu1 %v866_v4  ;;  %756 = vset.pattern.permute.xlu0 %v866_v4 }
  0x22   : > { %279 = vperm.xlu1 %757, %v235_v3   ;;  %275 = vperm.xlu0 %756, %v234_v2  }
  0x94   : > { %v258_v11 = vpop.permute.xlu1 %257  ;;  %v241_v13 = vpop.permute.xlu0 %240 }
  0x95   : > { %v268_v15 = vsub.f32 %v258_v11, %v267_v10  ;;  %v252_v16 = vsub.f32 %v241_v13, %v251_v12 }
  0x97   : > { %v270_v22 = vmul.f32 %v268_v15, %v268_v15  ;;  %v254_v23 = vmul.f32 %v252_v16, %v252_v16 }
  0x98   : > { %v262_v17 = vpop.permute.xlu1 %261  ;;  %v246_v18 = vpop.permute.xlu0 %245 }
  0x99   : > { %v269_v19 = vsub.f32 %v262_v17, %v267_v10  ;;  %v253_v20 = vsub.f32 %v246_v18, %v251_v12  ;;  %v272_v30 = vadd.f32 %v270_v22, %v254_v23 }
  0x9b   : > { %v271_v24 = vmul.f32 %v269_v19, %v269_v19  ;;  %v255_v25 = vmul.f32 %v253_v20, %v253_v20 }
  0x9d   : > { %v280_v26 = vpop.permute.xlu1 %279  ;;  %v276_v27 = vpop.permute.xlu0 %275  ;;  %v273_v31 = vadd.f32 %v271_v24, %v255_v25 }
  0x9e   : > { %v287_v28 = vsub.f32 %v280_v26, %v285_v21  ;;  %v286_v29 = vsub.f32 %v276_v27, %v285_v21 }
  0xa0   : > { %v289_v32 = vmul.f32 %v287_v28, %v287_v28  ;;  %v288_v33 = vmul.f32 %v286_v29, %v286_v29 }
  0xa2   : > { %v291_v34 = vadd.f32 %v289_v32, %v273_v31  ;;  %v290_v35 = vadd.f32 %v288_v33, %v272_v30 }
  0xa4   : > { %v298_v36 = vsel %vm294_vm0, %v291_v34, inf  ;;  %v295_v37 = vsel %vm294_vm0, %v290_v35, inf }
  0xa5   : > { %299 = vmin.xlane.f32.xlu0 %v298_v36  ;;  %296 = vmin.xlane.f32.xlu1 %v295_v37 }
 0x12e   : > { %v963_v39 = vpop.xlane.xlu1 %296  ;;  %v965_v40 = vpop.xlane.xlu0 %299 }
 0x12f   : > { %vm301_vm1 = vcmp.eq.f32.partialorder %v290_v35, %v963_v39  ;;  %vm302_vm2 = vcmp.eq.f32.partialorder %v291_v34, %v965_v40  ;;  %758 = vrsqrt.f32 %v963_v39  ;;  %vm339_vm11 = vcmp.eq.f32.partialorder %v963_v39, inf }
 0x130   : > { %v303_v41 = vsel %vm301_vm1, %v961_v38, 32  ;;  %v304_v42 = vsel %vm302_vm2, %v961_v38, 32  ;;  %760 = vrsqrt.f32 %v965_v40  ;;  %vm346_vm12 = vcmp.eq.f32.partialorder %v965_v40, inf }
 0x131   : > { %v305_v43 = vsel %vm294_vm0, %v303_v41, 2147483647  ;;  %v320_v44 = vsel %vm294_vm0, %v304_v42, 2147483647  ;;  %vm341_vm14 = vcmp.eq.f32.partialorder %v963_v39, 0.0  ;;  %v349_v36 = vand.u32 2147483648, %v965_v40 }
 0x132   : > { %v307_v45 = vshra.s32 %v305_v43, 16  ;;  %v322_v46 = vshra.s32 %v320_v44, 16  ;;  %v321_v49 = vand.u32 65535, %v320_v44  ;;  %v306_v50 = vand.u32 65535, %v305_v43 }
 0x133   : > { %vm348_vm1 = vcmp.eq.f32.partialorder %v965_v40, 0.0 }
 0x134   : > { %v309_v47 = vcvt.s32.f32 %v307_v45  ;;  %v324_v48 = vcvt.s32.f32 %v322_v46  ;;  %v323_v53 = vcvt.s32.f32 %v321_v49  ;;  %v308_v54 = vcvt.s32.f32 %v306_v50 }
 0x136   : > { %310 = vmin.xlane.f32.xlu0 %v309_v47  ;;  %325 = vmin.xlane.f32.xlu1 %v324_v48 }
 0x13c   : > { %v759_v25 = vpop.eup %758 }
 0x13d   : > { %v761_v26 = vpop.eup %760  ;;  %v338_v29 = vmul.f32 %v759_v25, %v963_v39 }
 0x13e   : > { %v345_v30 = vmul.f32 %v761_v26, %v965_v40 }
 0x13f   : > { %v340_v33 = vsel %vm339_vm11, %v963_v39, %v338_v29 }
 0x1bf   : > { %v326_v51 = vpop.xlane.xlu1 %325  ;;  %v311_v52 = vpop.xlane.xlu0 %310 }
 0x1c0   : > { %vm327_vm3 = vcmp.eq.f32.partialorder %v324_v48, %v326_v51  ;;  %vm312_vm4 = vcmp.eq.f32.partialorder %v309_v47, %v311_v52  ;;  %v332_v57 = vcvt.f32.s32 %v326_v51  ;;  %v317_v58 = vcvt.f32.s32 %v311_v52 }
 0x1c1   : > { %v328_v55 = vsel %vm327_vm3, %v323_v53, inf  ;;  %v313_v56 = vsel %vm312_vm4, %v308_v54, inf }
 0x1c2   : > { %329 = vmin.xlane.f32.xlu1 %v328_v55  ;;  %314 = vmin.xlane.f32.xlu0 %v313_v56  ;;  %v333_v61 = vshll.u32 %v332_v57, 16  ;;  %v318_v62 = vshll.u32 %v317_v58, 16 }
 0x24b   : > { %v330_v59 = vpop.xlane.xlu1 %329  ;;  %v315_v60 = vpop.xlane.xlu0 %314 }
 0x24c   : > { %v331_v63 = vcvt.f32.s32 %v330_v59  ;;  %v316_v0 = vcvt.f32.s32 %v315_v60 }
 0x24e   : > { %v973_v1 = vadd.s32 %v333_v61, %v331_v63  ;;  %v975_v2 = vadd.s32 %v318_v62, %v316_v0 }
 0x250   : > { %vm336_vm5 = vcmp.eq.s32.totalorder %v961_v38, %v973_v1  ;;  %vm335_vm6 = vcmp.eq.s32.totalorder %v961_v38, %v975_v2 }
 0x251   : > { %v984_v3 = vsel %vm336_vm5, 1e+30, %v291_v34  ;;  %v989_v4 = vsel %vm335_vm6, 1e+30, %v290_v35  ;;  %v342_v34 = vand.u32 2147483648, %v963_v39  ;;  %v347_v35 = vsel %vm346_vm12, %v965_v40, %v345_v30 }
 0x252   : > { %v366_v5 = vsel %vm294_vm0, %v984_v3, inf  ;;  %v363_v6 = vsel %vm294_vm0, %v989_v4, inf  ;;  %v350_v44 = vsel %vm348_vm1, %v349_v36, %v347_v35  ;;  %vm868_vm1 = vmmov 0  }
 0x253   : > { %367 = vmin.xlane.f32.xlu1 %v366_v5  ;;  %364 = vmin.xlane.f32.xlu0 %v363_v6  ;;  %v343_v41 = vsel %vm341_vm14, %v342_v34, %v340_v33  ;;  %v352_v49 = vadd.f32 1e-10, %v350_v44 }
 0x254   : > { %v351_v47 = vadd.f32 1e-10, %v343_v41 }
 0x2dc   : > { %v368_v7 = vpop.xlane.xlu1 %367  ;;  %v365_v8 = vpop.xlane.xlu0 %364 }
 0x2dd   : > { %vm370_vm7 = vcmp.eq.f32.partialorder %v984_v3, %v368_v7  ;;  %vm369_vm8 = vcmp.eq.f32.partialorder %v989_v4, %v365_v8  ;;  %762 = vrsqrt.f32 %v368_v7  ;;  %vm414_vm13 = vcmp.eq.f32.partialorder %v368_v7, inf }
 0x2de   : > { %v372_v9 = vsel %vm370_vm7, %v961_v38, 32  ;;  %v371_v10 = vsel %vm369_vm8, %v961_v38, 32  ;;  %764 = vrsqrt.f32 %v365_v8  ;;  %vm407_vm15 = vcmp.eq.f32.partialorder %v365_v8, inf }
 0x2df   : > { %v388_v11 = vsel %vm294_vm0, %v372_v9, 2147483647  ;;  %v373_v12 = vsel %vm294_vm0, %v371_v10, 2147483647  ;;  %v417_v42 = vand.u32 2147483648, %v368_v7  ;;  %vm416_vm2 = vcmp.eq.f32.partialorder %v368_v7, 0.0 }
 0x2e0   : > { %v390_v13 = vshra.s32 %v388_v11, 16  ;;  %v375_v14 = vshra.s32 %v373_v12, 16  ;;  %v389_v17 = vand.u32 65535, %v388_v11  ;;  %v374_v18 = vand.u32 65535, %v373_v12 }
 0x2e1   : > { %v410_v45 = vand.u32 2147483648, %v365_v8  ;;  %vm409_vm3 = vcmp.eq.f32.partialorder %v365_v8, 0.0  ;;  %766 = vrcp.f32 %v351_v47 }
 0x2e2   : > { %v392_v15 = vcvt.s32.f32 %v390_v13  ;;  %v377_v16 = vcvt.s32.f32 %v375_v14  ;;  %v391_v21 = vcvt.s32.f32 %v389_v17  ;;  %v376_v22 = vcvt.s32.f32 %v374_v18 }
 0x2e3   : > { %768 = vrcp.f32 %v352_v49 }
 0x2e4   : > { %393 = vmin.xlane.f32.xlu1 %v392_v15  ;;  %378 = vmin.xlane.f32.xlu0 %v377_v16 }
 0x2ea   : > { %v763_v27 = vpop.eup %762 }
 0x2eb   : > { %v765_v28 = vpop.eup %764  ;;  %v413_v31 = vmul.f32 %v763_v27, %v368_v7 }
 0x2ec   : > { %v406_v32 = vmul.f32 %v765_v28, %v365_v8 }
 0x2ed   : > { %v415_v37 = vsel %vm414_vm13, %v368_v7, %v413_v31 }
 0x2ee   : > { %v408_v43 = vsel %vm407_vm15, %v365_v8, %v406_v32  ;;  %v418_v46 = vsel %vm416_vm2, %v417_v42, %v415_v37  ;;  %v767_v58 = vpop.eup %766  ;;  %vm555_vm2 = vcmask 125952  }
 0x2ef   : > { %v411_v48 = vsel %vm409_vm3, %v410_v45, %v408_v43  ;;  %v420_v50 = vadd.f32 1e-10, %v418_v46  ;;  %v357_v5 = vsel %vm335_vm6, %v767_v58, 0.0 }
 0x2f0   : > { %v419_v51 = vadd.f32 1e-10, %v411_v48  ;;  %v769_v59 = vpop.eup %768 }
 0x2f1   : > { %770 = vrcp.f32 %v420_v50  ;;  %v358_v0 = vsel %vm336_vm5, %v769_v59, 0.0  ;;  %v867_v59 = vmov 0.0  }
 0x2f2   : > { %772 = vrcp.f32 %v419_v51  ;;  %688 = vmatprep.subr.bf16.mxu0 %v867_v59  ;;  %690 = vmatprep.mubr.msk.bf16.mxu0 %vm868_vm1, %v867_v59 }
 0x2fe   : > { %v771_v62 = vpop.eup %770 }
 0x2ff   : > { %v773_v63 = vpop.eup %772 }
 0x36d   : > { %v394_v19 = vpop.xlane.xlu1 %393  ;;  %v379_v20 = vpop.xlane.xlu0 %378 }
 0x36e   : > { %vm395_vm9 = vcmp.eq.f32.partialorder %v392_v15, %v394_v19  ;;  %vm380_vm10 = vcmp.eq.f32.partialorder %v377_v16, %v379_v20  ;;  %v400_v39 = vcvt.f32.s32 %v394_v19  ;;  %v385_v52 = vcvt.f32.s32 %v379_v20 }
 0x36f   : > { %v396_v23 = vsel %vm395_vm9, %v391_v21, inf  ;;  %v381_v24 = vsel %vm380_vm10, %v376_v22, inf }
 0x370   : > { %397 = vmin.xlane.f32.xlu1 %v396_v23  ;;  %382 = vmin.xlane.f32.xlu0 %v381_v24  ;;  %v401_v54 = vshll.u32 %v400_v39, 16  ;;  %v386_v55 = vshll.u32 %v385_v52, 16 }
 0x3f9   : > { %v398_v53 = vpop.xlane.xlu1 %397  ;;  %v383_v40 = vpop.xlane.xlu0 %382 }
 0x3fa   : > { %v399_v56 = vcvt.f32.s32 %v398_v53  ;;  %v384_v57 = vcvt.f32.s32 %v383_v40 }
 0x3fc   : > { %v402_v60 = vadd.s32 %v401_v54, %v399_v56  ;;  %v387_v61 = vadd.s32 %v386_v55, %v384_v57 }
 0x3fe   : > { %vm404_vm4 = vcmp.eq.s32.totalorder %v961_v38, %v402_v60  ;;  %vm403_vm7 = vcmp.eq.s32.totalorder %v961_v38, %v387_v61 }
 0x3ff   : > { %v430_v6 = vsel %vm404_vm4, 1e+30, %v984_v3  ;;  %v426_v7 = vsel %vm404_vm4, %v771_v62, 0.0  ;;  %v429_v8 = vsel %vm403_vm7, 1e+30, %v989_v4  ;;  %v425_v9 = vsel %vm403_vm7, %v773_v63, 0.0 }
 0x400   : > { %v434_v10 = vsel %vm294_vm0, %v430_v6, inf  ;;  %v431_v11 = vsel %vm294_vm0, %v429_v8, inf  ;;  %v1025_v1 = vadd.f32 %v426_v7, %v358_v0  ;;  %v1027_v12 = vadd.f32 %v425_v9, %v357_v5  ;;  %v237_v7 = vld [vmem:[%s232_s10] sm:$0xf] }
 0x401   : > { %435 = vmin.xlane.f32.xlu1 %v434_v10  ;;  %432 = vmin.xlane.f32.xlu0 %v431_v11 }
 0x48a   : > { %v436_v2 = vpop.xlane.xlu1 %435  ;;  %v433_v13 = vpop.xlane.xlu0 %432 }
 0x48b   : > { %vm438_vm5 = vcmp.eq.f32.partialorder %v430_v6, %v436_v2  ;;  %vm437_vm6 = vcmp.eq.f32.partialorder %v429_v8, %v433_v13  ;;  %774 = vrsqrt.f32 %v436_v2  ;;  %vm482_vm10 = vcmp.eq.f32.partialorder %v436_v2, inf }
 0x48c   : > { %v440_v3 = vsel %vm438_vm5, %v961_v38, 32  ;;  %v439_v14 = vsel %vm437_vm6, %v961_v38, 32  ;;  %776 = vrsqrt.f32 %v433_v13  ;;  %vm475_vm11 = vcmp.eq.f32.partialorder %v433_v13, inf }
 0x48d   : > { %v456_v4 = vsel %vm294_vm0, %v440_v3, 2147483647  ;;  %v441_v15 = vsel %vm294_vm0, %v439_v14, 2147483647  ;;  %v485_v33 = vand.u32 2147483648, %v436_v2  ;;  %vm484_vm12 = vcmp.eq.f32.partialorder %v436_v2, 0.0 }
 0x48e   : > { %v458_v16 = vshra.s32 %v456_v4, 16  ;;  %v443_v17 = vshra.s32 %v441_v15, 16  ;;  %v457_v20 = vand.u32 65535, %v456_v4  ;;  %v442_v21 = vand.u32 65535, %v441_v15 }
 0x48f   : > { %v478_v35 = vand.u32 2147483648, %v433_v13  ;;  %vm477_vm13 = vcmp.eq.f32.partialorder %v433_v13, 0.0 }
 0x490   : > { %v460_v18 = vcvt.s32.f32 %v458_v16  ;;  %v445_v19 = vcvt.s32.f32 %v443_v17  ;;  %v459_v24 = vcvt.s32.f32 %v457_v20  ;;  %v444_v25 = vcvt.s32.f32 %v442_v21 }
 0x492   : > { %461 = vmin.xlane.f32.xlu1 %v460_v18  ;;  %446 = vmin.xlane.f32.xlu0 %v445_v19 }
 0x498   : > { %v775_v28 = vpop.eup %774 }
 0x499   : > { %v777_v29 = vpop.eup %776  ;;  %v481_v30 = vmul.f32 %v775_v28, %v436_v2 }
 0x49a   : > { %v474_v31 = vmul.f32 %v777_v29, %v433_v13 }
 0x49b   : > { %v483_v32 = vsel %vm482_vm10, %v436_v2, %v481_v30 }
 0x49c   : > { %v476_v34 = vsel %vm475_vm11, %v433_v13, %v474_v31  ;;  %v486_v36 = vsel %vm484_vm12, %v485_v33, %v483_v32 }
 0x49d   : > { %v479_v37 = vsel %vm477_vm13, %v478_v35, %v476_v34  ;;  %v488_v41 = vadd.f32 1e-10, %v486_v36 }
 0x49e   : > { %v487_v42 = vadd.f32 1e-10, %v479_v37 }
 0x49f   : > { %778 = vrcp.f32 %v488_v41 }
 0x4a0   : > { %780 = vrcp.f32 %v487_v42 }
 0x4ac   : > { %v779_v52 = vpop.eup %778 }
 0x4ad   : > { %v781_v53 = vpop.eup %780 }
 0x51b   : > { %v462_v22 = vpop.xlane.xlu1 %461  ;;  %v447_v23 = vpop.xlane.xlu0 %446 }
 0x51c   : > { %vm463_vm8 = vcmp.eq.f32.partialorder %v460_v18, %v462_v22  ;;  %vm448_vm9 = vcmp.eq.f32.partialorder %v445_v19, %v447_v23  ;;  %v468_v43 = vcvt.f32.s32 %v462_v22  ;;  %v453_v44 = vcvt.f32.s32 %v447_v23 }
 0x51d   : > { %v464_v26 = vsel %vm463_vm8, %v459_v24, inf  ;;  %v449_v27 = vsel %vm448_vm9, %v444_v25, inf }
 0x51e   : > { %465 = vmin.xlane.f32.xlu1 %v464_v26  ;;  %450 = vmin.xlane.f32.xlu0 %v449_v27  ;;  %v469_v47 = vshll.u32 %v468_v43, 16  ;;  %v454_v48 = vshll.u32 %v453_v44, 16 }
 0x5a7   : > { %v466_v45 = vpop.xlane.xlu1 %465  ;;  %v451_v46 = vpop.xlane.xlu0 %450 }
 0x5a8   : > { %v467_v49 = vcvt.f32.s32 %v466_v45  ;;  %v452_v50 = vcvt.f32.s32 %v451_v46 }
 0x5aa   : > { %v470_v51 = vadd.s32 %v469_v47, %v467_v49  ;;  %v455_v39 = vadd.s32 %v454_v48, %v452_v50 }
 0x5ac   : > { %vm472_vm14 = vcmp.eq.s32.totalorder %v961_v38, %v470_v51  ;;  %vm471_vm15 = vcmp.eq.s32.totalorder %v961_v38, %v455_v39 }
 0x5ad   : > { %v494_v40 = vsel %vm472_vm14, %v779_v52, 0.0  ;;  %v493_v54 = vsel %vm471_vm15, %v781_v53, 0.0 }
 0x5ae   : > { %v496_v55 = vadd.f32 %v494_v40, %v1025_v1  ;;  %v495_v56 = vadd.f32 %v493_v54, %v1027_v12 }
 0x5b0   : > { %v500_v57 = vsel %vm294_vm0, %v496_v55, 0.0  ;;  %v497_v58 = vsel %vm294_vm0, %v495_v56, 0.0 }
 0x5b1   : > { %501 = vadd.xlane.f32.xlu1 %v500_v57  ;;  %498 = vadd.xlane.f32.xlu0 %v497_v58 }
 0x63a   : > { %v502_v60 = vpop.xlane.xlu1 %501  ;;  %v499_v38 = vpop.xlane.xlu0 %498 }
 0x63b   : > { %782 = vrcp.f32 %v502_v60 }
 0x63c   : > { %784 = vrcp.f32 %v499_v38 }
 0x648   : > { %v783_v61 = vpop.eup %782 }
 0x649   : > { %v785_v62 = vpop.eup %784  ;;  %v506_v63 = vmul.f32 %v783_v61, %v496_v55 }
 0x64a   : > { %v504_v0 = vmul.f32 %v785_v62, %v495_v56 }
 0x64c   : > { %v507_v5 = vpack.c.bf16 %v506_v63, %v504_v0 }
 0x64e   : > { %v512_v6 = vsel %vm294_vm0, %v507_v5, 0 }
 0x64f   : > { %689 = vmatpush3.bf16.xpose.msra.mxu0 %v512_v6 }
 0x656   : > { %691 = vmatmul.mubr.msk.bf16.vlgmr.msra.gmra.mxu0 %vm294_vm0, %v237_v7 }
 0x716   : > { %v548_v8 = vpop.f32.mrf.mxu0 }
 0x717   : > { %v554_v9 = vpack.c.bf16 %v548_v8, %v548_v8 }
 0x718   : > { %v692_v10 = vpop.f32.mrf.mxu0 }
 0x719   : > { %556 = vst.msk [vmem:[%s214_s21] sm:$0xf] %vm555_vm2, %v554_v9 }
 0x71a   : > { %v551_v11 = vpop.f32.mrf.mxu0 }
 0x71b   : > { %799 = shalt.err (!%p796_p5)
}
 0x71c   : > { %s800_s6 = scalar_lea.hbm %s1051_s26, 64  ;;  %s804_s9 = scalar_lea.hbm %s1100_s3, 128 }
 0x71d   : > { %p801_p6 = scmp.ne.s32.totalorder %s1051_s26, %s800_s6  ;;  %p805_p10 = scmp.lt.s32.totalorder %s1051_s26, %s1100_s3 }
 0x71e   : > { %p806_p11 = scmp.lt.s32.totalorder %s804_s9, %s800_s6 }
 0x71f   : > { %p802_p7 = pnand %p801_p6, %p930_p4 }
 0x720   : > { %p807_p12 = por %p806_p11, %p805_p10 }
 0x721   : > { %p803_p9 = pneg %p802_p7 }
 0x723   : > { %p808_p13 = pnand %p807_p12, %p803_p9 }
 0x725   : > { %811 = shalt.err (!%p808_p13)
}
 0x726   : > { %694 = dma.vmem_to_hbm [thread:$0]  (%p930_p4), %s1053_s23, 64, %s1051_s26, %s558_s29   ;;  %v693_v1 = vpop.f32.mrf.mxu0 }
 0x727 PF: > { %p700_p0 = scmp.ge.s32.totalorder %s862_s17, 2  ;;  %s584_s18 = sand.u32 1, %s842_s12  }
 0x728   : > { %s585_s19 = scalar_lea.sflag [#allocation3], %s584_s18 }
 0x729   : > { %p697_p1 = pnand %p700_p0, %p937_p8 }
 0x72b   : > { %p698_p2 = pneg %p697_p1 }
 0x72d   : > { %837 = dma.done.wait (%p698_p2), %s585_s19, 64  }
 0x72e   : > { %839 = vsyncadd (%p698_p2), %s585_s19, 4294967232  ;;  %s16_s17 = sadd.s32 1, %s862_s17   ;;  %s1103_s12 = smov %s846_s13 }
 0x72f   : > { %p13_p3 = scmp.ge.s32.totalorder %s16_s17, 4   ;;  %s1104_s13 = smov %s850_s14 }
 0x730   : > { %s1105_s14 = smov %s943_s25  ;;  %s1106_s15 = smov %s858_s16 }
 0x731   : > { %s1107_s16 = smov %s1109_s20  ;;  %15 = sbr.rel (!%p13_p3) target bundleno = 4 (0x4), region = 73 }
 0x736   :  { %590 = vsyncpa [#allocation3], 1 }
 0x737   :  { %592 = vsyncpa [#allocation3 + $0x1], 1 }

</bundles_post_ra>
